<compile_context>
chip_gen: v5e
topology: v5e:2x2
jax: 0.10.0
libtpu: 0.0.40
codegen_flags: <defaults>
</compile_context>

<pallas_src>
import functools
import math

import jax
import jax.numpy as jnp
from jax import lax
from jax.experimental import pallas as pl
from jax.experimental.pallas import tpu as pltpu


def _flash_attention_kernel(q_ref, k_ref, v_ref, o_ref, row_max, acc,
                            *, sum_col, exp_dtype):
    """Grid = (batch, q_tiles, kv_tiles); kv is the innermost reduction axis.

    Block views (batch dim squeezed via pl.Squeezed()):
      q_ref : (tq, Dp)  query tile, already projected/scaled/zero-padded
      k_ref : (tk, Dp)  key tile, zero-padded
      v_ref : (tk, Dp)  value tile, Wv folded in; column `sum_col` is all ones
      o_ref : (tq, Dp)  lane-dense output tile (real data in columns [:D])
    f32 scratch (persists across the kv axis):
      row_max: (tq, 1)   online-softmax running max
      acc    : (tq, Dp)  un-normalized exp(scores) @ v; column `sum_col` holds
                         the running softmax denominator (MXU-accumulated)
    """
    kv_idx = pl.program_id(2)

    @pl.when(kv_idx == 0)
    def _init():
        row_max[...] = jnp.full_like(row_max, -jnp.inf)
        acc[...] = jnp.zeros_like(acc)

    # Scores for this kv tile: (tq, tk). MXU operands stay in the input dtype
    # (bf16 fast path) with f32 accumulation; contraction over the padded
    # feature dim (zero columns contribute nothing). No k transpose needed.
    s = lax.dot_general(q_ref[...], k_ref[...],
                        dimension_numbers=(((1,), (1,)), ((), ())),
                        preferred_element_type=jnp.float32)

    # Online softmax update. Only a (tq, tk) tile is ever live. exp_dtype is
    # bf16 on v6e/v7x bf16 runs (2x EUP rate), f32 otherwise (v5e-safe).
    tile_max = jnp.max(s, axis=-1, keepdims=True)
    new_max = jnp.maximum(row_max[...], tile_max)
    alpha = jnp.exp(row_max[...] - new_max)                 # (tq, 1) f32
    p = jnp.exp((s - new_max).astype(exp_dtype))            # (tq, tk)
    # The ones column in v_ref makes acc[:, sum_col] accumulate the softmax
    # denominator (f32 MXU accumulation) alongside the context.
    acc[...] = alpha * acc[...] + jnp.dot(p.astype(v_ref.dtype), v_ref[...],
                                          preferred_element_type=jnp.float32)
    row_max[...] = new_max

    @pl.when(kv_idx == pl.num_programs(2) - 1)
    def _finalize():
        a = acc[...]
        denom = a[:, sum_col:sum_col + 1]                   # (tq, 1)
        if o_ref.dtype == jnp.float32:
            inv = 1.0 / denom                               # exact for f32 out
        else:
            inv = pl.reciprocal(denom, approx=True)         # EUP slot, ~free
        # Lane-dense (tq, 128*k) store; padded columns are sliced off outside.
        o_ref[...] = (a * inv).astype(o_ref.dtype)


def _divisor_tile(s: int, cap: int) -> int:
    """Largest t <= cap with s % t == 0 and t a multiple of 8 (or t == s)."""
    if s <= cap:
        return s
    t = (cap // 8) * 8
    while t >= 8:
        if s % t == 0:
            return t
        t -= 8
    # TODO(synk): for awkward (e.g. prime) S this falls back to the full axis,
    # materializing an (S, S) score tile; pad + mask the sequence instead.
    return s


def _pick_q_tile(s: int, b: int, cap: int) -> int:
    t = _divisor_tile(s, cap)
    # Keep >= 2 parallel grid steps so both v7x TensorCores get work.
    if b * (s // t) < 2:
        smaller = _divisor_tile(s, max(8, t // 2))
        if smaller < t and s % smaller == 0:
            t = smaller
    return t


def _vmem_budget_bytes() -> int:
    """Generation-aware scoped-VMEM cap (headroom below physical VMEM)."""
    cap = None
    try:
        cap = getattr(pltpu.get_tpu_info(), "vmem_capacity_bytes", None)
    except Exception:
        cap = None
    if not cap:
        kind = jax.devices()[0].device_kind.lower()
        cap = (64 << 20) if "v7" in kind else (128 << 20)
    return (int(cap) * 3) // 4           # ~48 MiB on v7x, ~96 MiB on v5e/v6e


def _supports_bf16_eup() -> bool:
    """bf16 EUP (exp) exists on v6e/v7x; v5e and older are f32-only."""
    kind = jax.devices()[0].device_kind.lower()
    return not any(t in kind for t in ("v2", "v3", "v4", "v5"))


def attention_pallas(q, k, v, wq_t, wk_t, wv_t, *, q_tile=1024, kv_tile=512):
    """q, k, v: (B, S, D). wq_t/wk_t: (D, D//reduction), wv_t: (D, D)
    (nn.Linear weights pre-transposed, i.e. weight.T)."""
    B, S, D = q.shape
    Dr = wq_t.shape[1]
    dtype = q.dtype
    itemsize = dtype.itemsize

    # Fold projections (exact by associativity; rounding order differs slightly
    # from the PyTorch reference, well below the test tolerances):
    #   scores = (q Wq^T)(k Wk^T)^T / sqrt(Dr) = (q [Wq^T Wk / sqrt(Dr)]) k^T
    #   output = (attn @ v) Wv^T               = attn @ (v Wv^T)
    m_mat = (jnp.dot(wq_t.astype(jnp.float32), wk_t.astype(jnp.float32).T)
             * (1.0 / math.sqrt(Dr))).astype(dtype)
    q_eff = jnp.einsum("bsd,de->bse", q, m_mat).astype(dtype)
    v_eff = jnp.einsum("bsd,de->bse", v, wv_t).astype(dtype)

    # Lane-dense feature dim: zero-pad to a multiple of 128 (+1 slot for the
    # ones column that carries the softmax denominator through the p@v matmul).
    sum_col = D
    Dp = ((D + 1 + 127) // 128) * 128
    pad = Dp - D
    q_pad = jnp.pad(q_eff, ((0, 0), (0, 0), (0, pad)))
    k_pad = jnp.pad(k.astype(dtype), ((0, 0), (0, 0), (0, pad)))
    v_pad = jnp.pad(v_eff, ((0, 0), (0, 0), (0, pad)))
    v_pad = v_pad.at[..., sum_col].set(1.0)

    tq = _pick_q_tile(S, B, q_tile)
    tk = _divisor_tile(S, kv_tile)
    grid = (B, S // tq, S // tk)

    q_spec = pl.BlockSpec((pl.Squeezed(), tq, Dp), lambda b, i, j: (b, i, 0))
    kv_spec = pl.BlockSpec((pl.Squeezed(), tk, Dp), lambda b, i, j: (b, j, 0))
    out_spec = pl.BlockSpec((pl.Squeezed(), tq, Dp), lambda b, i, j: (b, i, 0))

    # VMEM estimate: double-buffered tiles + scratch + the in-kernel (tq, tk)
    # score/exp temporaries (which dominate at large tiles), plus headroom,
    # clamped to a generation-aware cap (< 64 MiB on v7x).
    est = (2 * tq * Dp * itemsize            # q tile, 2-deep
           + 2 * 2 * tk * Dp * itemsize      # k + v tiles, 2-deep
           + 2 * tq * Dp * itemsize          # out tile, 2-deep
           + tq * Dp * 4 + tq * 4            # acc + row_max scratch (f32)
           + 3 * tq * tk * 4)                # s / shifted / p temporaries
    vmem_limit = int(min(_vmem_budget_bytes(), 2 * est + (8 << 20)))

    exp_dtype = (jnp.bfloat16
                 if (dtype == jnp.bfloat16 and _supports_bf16_eup())
                 else jnp.float32)
    kernel = functools.partial(_flash_attention_kernel,
                               sum_col=sum_col, exp_dtype=exp_dtype)

    out_padded = pl.pallas_call(
        kernel,
        out_shape=jax.ShapeDtypeStruct((B, S, Dp), dtype),
        grid_spec=pltpu.PrefetchScalarGridSpec(
            num_scalar_prefetch=0,
            grid=grid,
            in_specs=[q_spec, kv_spec, kv_spec],
            out_specs=out_spec,
            scratch_shapes=[
                pltpu.VMEM((tq, 1), jnp.float32),    # row_max
                pltpu.VMEM((tq, Dp), jnp.float32),   # acc (+ denominator col)
            ],
        ),
        compiler_params=pltpu.CompilerParams(
            # batch / q-tile axes shard across megacore TCs; kv axis is the
            # sequential online-softmax reduction.
            dimension_semantics=("parallel", "parallel", "arbitrary"),
            vmem_limit_bytes=vmem_limit,
        ),
    )(q_pad, k_pad, v_pad)

    return out_padded[..., :D]


def attention_ref(q, k, v, wq_t, wk_t, wv_t):
    """Pure-JAX reference matching the PyTorch forward exactly."""
    qp = jnp.einsum("bsd,de->bse", q, wq_t)
    kp = jnp.einsum("bsd,de->bse", k, wk_t)
    u = jnp.einsum("bqe,bke->bqk", qp, kp) / math.sqrt(qp.shape[-1])
    attn = jax.nn.softmax(u, axis=-1)
    ctx = jnp.einsum("bqk,bkd->bqd", attn, v)
    return jnp.einsum("bqd,de->bqe", ctx, wv_t)


if __name__ == "__main__":
    d_model = 32
    reduction = 4
    d_r = d_model // reduction
    B, S = 2, 8

    key = jax.random.PRNGKey(0)
    kq, kk, kv_, kwq, kwk, kwv = jax.random.split(key, 6)

    q = jax.random.normal(kq, (B, S, d_model), dtype=jnp.float32)
    k = jax.random.normal(kk, (B, S, d_model), dtype=jnp.float32)
    v = jax.random.normal(kv_, (B, S, d_model), dtype=jnp.float32)

    # nn.Linear weights are (out, in); store pre-transposed as (in, out).
    bound = 1.0 / math.sqrt(d_model)
    wq_t = jax.random.uniform(kwq, (d_model, d_r), minval=-bound, maxval=bound,
                              dtype=jnp.float32)
    wk_t = jax.random.uniform(kwk, (d_model, d_r), minval=-bound, maxval=bound,
                              dtype=jnp.float32)
    wv_t = jax.random.uniform(kwv, (d_model, d_model), minval=-bound, maxval=bound,
                              dtype=jnp.float32)

    # 1) Small f32 check at the module's natural shape (single kv tile path).
    out = attention_pallas(q, k, v, wq_t, wk_t, wv_t)
    out = jax.block_until_ready(out)
    ref = attention_ref(q, k, v, wq_t, wk_t, wv_t)
    assert out.shape == (B, S, d_model)
    assert jnp.allclose(out, ref, atol=1e-4, rtol=1e-4), "f32 mismatch vs reference"

    # 2) Tiled flash path (multiple q / kv tiles) in f32.
    S2 = 256
    kq2, kk2, kv2 = jax.random.split(jax.random.PRNGKey(1), 3)
    q2 = jax.random.normal(kq2, (B, S2, d_model), dtype=jnp.float32)
    k2 = jax.random.normal(kk2, (B, S2, d_model), dtype=jnp.float32)
    v2 = jax.random.normal(kv2, (B, S2, d_model), dtype=jnp.float32)
    out2 = attention_pallas(q2, k2, v2, wq_t, wk_t, wv_t, q_tile=128, kv_tile=64)
    out2 = jax.block_until_ready(out2)
    ref2 = attention_ref(q2, k2, v2, wq_t, wk_t, wv_t)
    assert jnp.allclose(out2, ref2, atol=1e-4, rtol=1e-4), "tiled f32 mismatch"

    # 3) bf16 operands (MXU fast path; bf16 exp on v6e/v7x, f32 softmax state).
    to_bf16 = lambda x: x.astype(jnp.bfloat16)
    out_bf = attention_pallas(to_bf16(q2), to_bf16(k2), to_bf16(v2),
                              to_bf16(wq_t), to_bf16(wk_t), to_bf16(wv_t),
                              q_tile=128, kv_tile=64)
    out_bf = jax.block_until_ready(out_bf)
    ref_bf = attention_ref(*(to_bf16(x).astype(jnp.float32)
                             for x in (q2, k2, v2, wq_t, wk_t, wv_t)))
    assert out_bf.dtype == jnp.bfloat16
    # Tolerance covers bf16 rounding of the folded projections + bf16 exp.
    assert jnp.allclose(out_bf.astype(jnp.float32), ref_bf, atol=4e-2, rtol=4e-2), \
        "bf16 mismatch vs reference"

    print("KERNEL_OK")
</pallas_src>

<mosaic_0001>
module attributes {stable_mosaic.version = 11 : i64} {
  func.func @_flash_attention_kernel(%arg0: i32, %arg1: i32, %arg2: i32, %arg3: memref<1x8x128xf32, #tpu.memory_space<vmem>>, %arg4: memref<1x8x128xf32, #tpu.memory_space<vmem>>, %arg5: memref<1x8x128xf32, #tpu.memory_space<vmem>>, %arg6: memref<1x8x128xf32, #tpu.memory_space<vmem>>, %arg7: memref<8x1xf32, #tpu.memory_space<vmem>>, %arg8: memref<8x128xf32, #tpu.memory_space<vmem>>) attributes {dimension_semantics = [#tpu.dimension_semantics<parallel>, #tpu.dimension_semantics<parallel>, #tpu.dimension_semantics<arbitrary>], iteration_bounds = array<i64: 2, 1, 1>, scalar_prefetch = 0 : i64, scratch_operands = 2 : i64, tpu.core_type = #tpu.core_type<tc>, window_params = [{transform_indices = @transform_0, window_bounds = array<i64: 1, 8, 128>}, {transform_indices = @transform_1, window_bounds = array<i64: 1, 8, 128>}, {transform_indices = @transform_2, window_bounds = array<i64: 1, 8, 128>}, {transform_indices = @transform_3, window_bounds = array<i64: 1, 8, 128>}]} {
    %c0_i32 = arith.constant 0 : i32
    %0 = arith.cmpi eq, %arg2, %c0_i32 : i32
    %1 = arith.extui %0 : i1 to i32
    %c0_i32_0 = arith.constant 0 : i32
    %2 = arith.cmpi ne, %1, %c0_i32_0 : i32
    scf.if %2 {
      %cst_23 = arith.constant 0xFF800000 : f32
      %30 = vector.broadcast %cst_23 : f32 to vector<8x1xf32>
      %c0_24 = arith.constant 0 : index
      %c0_25 = arith.constant 0 : index
      %31 = vector.load %arg7[%c0_24, %c0_25] : memref<8x1xf32, #tpu.memory_space<vmem>>, vector<8x1xf32>
      tpu.vector_store %arg7[%c0_24, %c0_25], %30 {strides = array<i32>} : memref<8x1xf32, #tpu.memory_space<vmem>>, vector<8x1xf32>,
      %cst_26 = arith.constant 0.000000e+00 : f32
      %32 = vector.broadcast %cst_26 : f32 to vector<8x128xf32>
      %c0_27 = arith.constant 0 : index
      %c0_28 = arith.constant 0 : index
      %33 = vector.load %arg8[%c0_27, %c0_28] : memref<8x128xf32, #tpu.memory_space<vmem>>, vector<8x128xf32>
      tpu.vector_store %arg8[%c0_27, %c0_28], %32 {strides = array<i32>} : memref<8x128xf32, #tpu.memory_space<vmem>>, vector<8x128xf32>,
    } else {
    }
    %c0 = arith.constant 0 : index
    %c0_1 = arith.constant 0 : index
    %c0_2 = arith.constant 0 : index
    %3 = vector.load %arg3[%c0, %c0_1, %c0_2] : memref<1x8x128xf32, #tpu.memory_space<vmem>>, vector<1x8x128xf32>
    %4 = vector.shape_cast %3 : vector<1x8x128xf32> to vector<8x128xf32>
    %c0_3 = arith.constant 0 : index
    %c0_4 = arith.constant 0 : index
    %c0_5 = arith.constant 0 : index
    %5 = vector.load %arg4[%c0_3, %c0_4, %c0_5] : memref<1x8x128xf32, #tpu.memory_space<vmem>>, vector<1x8x128xf32>
    %6 = vector.shape_cast %5 : vector<1x8x128xf32> to vector<8x128xf32>
    %cst = arith.constant dense<0.000000e+00> : vector<8x8xf32>
    %7 = tpu.matmul %4, %6, %cst {dimension_numbers = #tpu.dot_dimension_numbers<[1], [1], [0], [0], [0, 0, 1, 0], [], []>} : vector<8x128xf32>, vector<8x128xf32>, vector<8x8xf32> -> vector<8x8xf32>
    %cst_6 = arith.constant dense<0xFF800000> : vector<8xf32>
    %8 = vector.multi_reduction <maximumf>, %7, %cst_6 [1] : vector<8x8xf32> to vector<8xf32>
    %9 = vector.shape_cast %8 : vector<8xf32> to vector<8x1xf32>
    %c0_7 = arith.constant 0 : index
    %c0_8 = arith.constant 0 : index
    %10 = vector.load %arg7[%c0_7, %c0_8] : memref<8x1xf32, #tpu.memory_space<vmem>>, vector<8x1xf32>
    %11 = arith.maximumf %10, %9 : vector<8x1xf32>
    %c0_9 = arith.constant 0 : index
    %c0_10 = arith.constant 0 : index
    %12 = vector.load %arg7[%c0_9, %c0_10] : memref<8x1xf32, #tpu.memory_space<vmem>>, vector<8x1xf32>
    %13 = arith.subf %12, %11 : vector<8x1xf32>
    %14 = math.exp %13 : vector<8x1xf32>
    %15 = vector.broadcast %11 : vector<8x1xf32> to vector<8x8xf32>
    %16 = arith.subf %7, %15 : vector<8x8xf32>
    %17 = math.exp %16 : vector<8x8xf32>
    %c0_11 = arith.constant 0 : index
    %c0_12 = arith.constant 0 : index
    %18 = vector.load %arg8[%c0_11, %c0_12] : memref<8x128xf32, #tpu.memory_space<vmem>>, vector<8x128xf32>
    %19 = vector.broadcast %14 : vector<8x1xf32> to vector<8x128xf32>
    %20 = arith.mulf %19, %18 : vector<8x128xf32>
    %c0_13 = arith.constant 0 : index
    %c0_14 = arith.constant 0 : index
    %c0_15 = arith.constant 0 : index
    %21 = vector.load %arg5[%c0_13, %c0_14, %c0_15] : memref<1x8x128xf32, #tpu.memory_space<vmem>>, vector<1x8x128xf32>
    %22 = vector.shape_cast %21 : vector<1x8x128xf32> to vector<8x128xf32>
    %cst_16 = arith.constant dense<0.000000e+00> : vector<8x128xf32>
    %23 = tpu.matmul %17, %22, %cst_16 {dimension_numbers = #tpu.dot_dimension_numbers<[1], [0], [0], [1], [0, 0, 1, 1], [], []>} : vector<8x8xf32>, vector<8x128xf32>, vector<8x128xf32> -> vector<8x128xf32>
    %24 = arith.addf %20, %23 : vector<8x128xf32>
    %c0_17 = arith.constant 0 : index
    %c0_18 = arith.constant 0 : index
    %25 = vector.load %arg8[%c0_17, %c0_18] : memref<8x128xf32, #tpu.memory_space<vmem>>, vector<8x128xf32>
    tpu.vector_store %arg8[%c0_17, %c0_18], %24 {strides = array<i32>} : memref<8x128xf32, #tpu.memory_space<vmem>>, vector<8x128xf32>,
    %c0_19 = arith.constant 0 : index
    %c0_20 = arith.constant 0 : index
    %26 = vector.load %arg7[%c0_19, %c0_20] : memref<8x1xf32, #tpu.memory_space<vmem>>, vector<8x1xf32>
    tpu.vector_store %arg7[%c0_19, %c0_20], %11 {strides = array<i32>} : memref<8x1xf32, #tpu.memory_space<vmem>>, vector<8x1xf32>,
    %c0_i32_21 = arith.constant 0 : i32
    %27 = arith.cmpi eq, %arg2, %c0_i32_21 : i32
    %28 = arith.extui %27 : i1 to i32
    %c0_i32_22 = arith.constant 0 : i32
    %29 = arith.cmpi ne, %28, %c0_i32_22 : i32
    scf.if %29 {
      %c0_23 = arith.constant 0 : index
      %c0_24 = arith.constant 0 : index
      %30 = vector.load %arg8[%c0_23, %c0_24] : memref<8x128xf32, #tpu.memory_space<vmem>>, vector<8x128xf32>
      %31 = vector.extract_strided_slice %30 {offsets = [0, 32], sizes = [8, 1], strides = [1, 1]} : vector<8x128xf32> to vector<8x1xf32>
      %cst_25 = arith.constant 1.000000e+00 : f32
      %32 = vector.broadcast %cst_25 : f32 to vector<8x1xf32>
      %33 = arith.divf %32, %31 : vector<8x1xf32>
      %34 = vector.broadcast %33 : vector<8x1xf32> to vector<8x128xf32>
      %35 = arith.mulf %30, %34 : vector<8x128xf32>
      %c0_26 = arith.constant 0 : index
      %c0_27 = arith.constant 0 : index
      %c0_28 = arith.constant 0 : index
      %36 = vector.load %arg6[%c0_26, %c0_27, %c0_28] : memref<1x8x128xf32, #tpu.memory_space<vmem>>, vector<1x8x128xf32>
      %37 = vector.shape_cast %36 : vector<1x8x128xf32> to vector<8x128xf32>
      %38 = vector.shape_cast %35 : vector<8x128xf32> to vector<1x8x128xf32>
      tpu.vector_store %arg6[%c0_26, %c0_27, %c0_28], %38 {strides = array<i32>} : memref<1x8x128xf32, #tpu.memory_space<vmem>>, vector<1x8x128xf32>,
    } else {
    }
    return
  }
  func.func @transform_0(%arg0: i32, %arg1: i32, %arg2: i32) -> (i32, i32, i32) {
    %c0_i32 = arith.constant 0 : i32
    %c0_i32_0 = arith.constant 0 : i32
    return %arg0, %arg1, %c0_i32 : i32, i32, i32
  }
  func.func @transform_1(%arg0: i32, %arg1: i32, %arg2: i32) -> (i32, i32, i32) {
    %c0_i32 = arith.constant 0 : i32
    %c0_i32_0 = arith.constant 0 : i32
    return %arg0, %arg2, %c0_i32 : i32, i32, i32
  }
  func.func @transform_2(%arg0: i32, %arg1: i32, %arg2: i32) -> (i32, i32, i32) {
    %c0_i32 = arith.constant 0 : i32
    %c0_i32_0 = arith.constant 0 : i32
    return %arg0, %arg2, %c0_i32 : i32, i32, i32
  }
  func.func @transform_3(%arg0: i32, %arg1: i32, %arg2: i32) -> (i32, i32, i32) {
    %c0_i32 = arith.constant 0 : i32
    %c0_i32_0 = arith.constant 0 : i32
    return %arg0, %arg1, %c0_i32 : i32, i32, i32
  }
}

</mosaic_0001>

<bundles_post_ra>
// kernel: tpu_custom_call.1
= control target key start
LH: loop header
LB: loop body
LE: loop exit
PB: predicated region body
PF: predicated region fallthrough
CT: control target
= control target key end

     0   :  { %s1011_s0 = inlined_call_operand.hbm [shape: f32[2,8,128], index: 0, kind: input, shape index: {}]   ;;  %s1012_s1 = inlined_call_operand.hbm [shape: f32[2,8,128], index: 1, kind: input, shape index: {}]   ;;  %s1013_s2 = inlined_call_operand.hbm [shape: f32[2,8,128], index: 2, kind: input, shape index: {}]   ;;  %s1014_s3 = inlined_call_operand.hbm [shape: f32[2,8,128], index: 3, kind: output, shape index: {}]  }
   0x1   :  { %1017 = sst [smem:[#allocation17_spill]] %s1012_s1 }
   0x2   :  { %8 = vsyncpa [#allocation5], 0 }
   0x3   :  { %10 = vsyncpa [#allocation5 + $0x1], 0 }
   0x4   :  { %11 = vsyncpa [#allocation8], 0 }
   0x5   :  { %13 = vsyncpa [#allocation8 + $0x1], 0 }
   0x6   :  { %14 = vsyncpa [#allocation6], 0 }
   0x7   :  { %16 = vsyncpa [#allocation6 + $0x1], 0  ;;  %s851_s12 = smov 0   ;;  %s853_s13 = smov 0  }
   0x8   :  { %s855_s14 = smov 0   ;;  %s857_s15 = smov 0  }
   0x9   :  { %s859_s16 = smov 0   ;;  %s861_s17 = smov 0  }
   0xa LB: > { %1018 = sst [smem:[#allocation14_spill]] %s822_s16  ;;  %s882_s18 = sadd.s32 4294967295, %s826_s17   ;;  %s826_s17 = sphi %s861_s17, %s22_s17   ;;  %s822_s16 = sphi %s859_s16, %s1030_s16   ;;  %s818_s15 = sphi %s857_s15, %s1029_s15   ;;  %s814_s14 = sphi %s855_s14, %s1033_s14   ;;  %s810_s13 = sphi %s853_s13, %s1032_s13   ;;  %s806_s12 = sphi %s851_s12, %s1031_s12  }
   0xb   : > { %s546_s19 = sadd.s32 4294967294, %s826_s17   ;;  %s41_s20 = sadd.s32 1, %s822_s16 }
   0xc   : > { %s50_s21 = sadd.s32 1, %s814_s14  ;;  %p43_p0 = scmp.ge.s32.totalorder %s41_s20, 2 }
   0xd   : > { %p57_p1 = scmp.ne.s32.totalorder %s814_s14, %s810_s13  ;;  %p58_p2 = scmp.eq.s32.totalorder %s826_s17, 0 }
   0xe   : > { %p63_p3 = scmp.ne.s32.totalorder %s810_s13, %s806_s12  ;;  %s1035_s20 = smov (%p43_p0, %s41_s20), 0 }
   0xf   : > { %1019 = sst [smem:[#allocation15_spill]] %s1035_s20  ;;  %p894_p4 = por %p58_p2, %p57_p1 }
  0x10   : > { %p64_p5 = scmp.eq.s32.totalorder %s882_s18, 0  ;;  %s45_s23 = ssub.s32 %s822_s16, %s1035_s20 }
  0x11   : > { %p145_p6 = scmp.eq.s32.totalorder %s882_s18, 1  ;;  %p48_p7 = scmp.eq.s32.totalorder %s45_s23, 0 }
  0x12   : > { %p902_p8 = por %p64_p5, %p63_p3  ;;  %p151_p10 = scmp.eq.s32.totalorder %s546_s19, 1 }
  0x13   : > { %p906_p9 = por %p145_p6, %p57_p1  ;;  %p548_p12 = scmp.ge.s32.totalorder %s826_s17, 2 }
  0x14   : > { %s911_s26 = scalar_select %p48_p7, %s814_s14, %s50_s21  }
  0x15   : > { %p913_p11 = por %p151_p10, %p63_p3  ;;  %p587_p13 = scmp.lt.s32.totalorder %s826_s17, 2 }
  0x16   : > { %1023 = sst [smem:[#allocation16_spill]] %s911_s26  ;;  %s171_s28 = sand.u32 1, %s814_s14  }
  0x17   : > { %s549_s29 = sshll.u32 %s171_s28, 3  ;;  %s550_s30 = sshll.u32 %s822_s16, 3 }
  0x18   : > { %p923_p0 = pnand %p587_p13, %p894_p4  ;;  %s191_s5 = sand.u32 1, %s826_s17  }
  0x19   : > { %s1026_s1 = sld [smem:[#allocation17_spill]]  ;;  %s195_s10 = scalar_lea.vmem [#allocation7], %s549_s29 }
  0x1a   : > { %s204_s11 = sshll.u32 %s195_s10, 4  ;;  %s192_s19 = scalar_lea.sflag [#allocation8], %s191_s5  ;;  %s205_s11 = int_to_ptr.vmem [resolvable:$true] %s204_s11 }
  0x1b   : > { %p555_p1 = scmp.ge.s32.totalorder %s826_s17, 1  ;;  %p229_p2 = scmp.lt.s32.totalorder %s826_s17, 3 }
  0x1c   : > { %s180_s6 = scalar_lea.hbm %s1011_s0, %s550_s30  ;;  %s172_s10 = scalar_lea.sflag [#allocation5], %s171_s28 }
  0x1d   : > { %p935_p3 = pnand %p555_p1, %p229_p2  ;;  %s182_s7 = sshll.u32 %s180_s6, 4  ;;  %s183_s7 = int_to_ptr.hbm [resolvable:$true] %s182_s7 }
  0x1e   : > { %s215_s16 = scalar_lea.vmem [#allocation9], %s549_s29  ;;  %s952_s22 = sand.u32 (!%p935_p3), 1, %s810_s13  }
  0x1f   : > { %s200_s8 = scalar_lea.hbm %s1026_s1, %s550_s30  ;;  %s224_s26 = sshll.u32 %s215_s16, 4  ;;  %s225_s26 = int_to_ptr.vmem [resolvable:$true] %s224_s26 }
  0x20   : > { %s202_s9 = sshll.u32 %s200_s8, 4  ;;  %s175_s8 = scalar_lea.vmem [#allocation4], %s549_s29  ;;  %s203_s9 = int_to_ptr.hbm [resolvable:$true] %s202_s9 }
  0x21   : > { %579 = dma.hbm_to_vmem [thread:$0]  (!%p923_p0), %s203_s9, 128, %s205_s11, %s192_s19  }
  0x22   : > { %s184_s1 = sshll.u32 %s175_s8, 4  ;;  %s220_s11 = scalar_lea.hbm %s1013_s2, %s550_s30  ;;  %s185_s1 = int_to_ptr.vmem [resolvable:$true] %s184_s1 }
  0x23   : > { %576 = dma.hbm_to_vmem [thread:$0]  (!%p923_p0), %s183_s7, 128, %s185_s1, %s172_s10  }
  0x24   : > { %s222_s20 = sshll.u32 %s220_s11, 4  ;;  %233 = sbr.rel (%p935_p3) target bundleno = 685 (0x2ad), region = 32  ;;  %s223_s20 = int_to_ptr.hbm [resolvable:$true] %s222_s20 }
  0x25   : > { %582 = dma.hbm_to_vmem [thread:$0]  (!%p923_p0), %s223_s20, 128, %s225_s26, %s192_s19  }
  0x26   : > { %s955_s1 = sshll.u32 (!%p935_p3), %s952_s22, 3  ;;  %s236_s28 = scalar_lea.sflag (!%p935_p3), [#allocation5], %s952_s22 }
  0x27   : > { %s239_s30 = scalar_lea.vmem (!%p935_p3), [#allocation4], %s955_s1 }
  0x29   : > { %793 = dma.done.wait (%p902_p8), %s236_s28, 128  }
  0x2a   : > { %795 = vsyncadd (%p902_p8), %s236_s28, 4294967168  ;;  %s245_s16 = sand.u32 1, %s882_s18   ;;  %s249_s26 = scalar_lea.vmem [#allocation7], %s955_s1 }
  0x2b   : > { %s246_s20 = scalar_lea.sflag [#allocation8], %s245_s16 }
  0x2c   : > { %797 = dma.done.wait (%p902_p8), %s246_s20, 256  }
  0x2d   : > { %799 = vsyncadd (%p902_p8), %s246_s20, 4294967040  ;;  %v301_v0 = vld [vmem:[%s249_s26] sm:$0xff]  ;;  %v300_v1 = vld [vmem:[%s239_s30] sm:$0xff]  ;;  %vm297_vm0 = vcmask 7168   ;;  %v828_v2 = vmov -inf   ;;  %vm322_vm1 = vcmask 64512  }
  0x2e   : > { %317 = vmatpush.xpose.msra.mxu0 %v301_v0  ;;  %298 = vst.msk [vmem:[#allocation2] sm:$0xff] %vm297_vm0, %v828_v2  ;;  %v829_v5 = vmov 0   ;;  %s259_s18 = scalar_lea.vmem [#allocation9], %s955_s1  ;;  %v830_v17 = vmov 32   ;;  %s562_s24 = sshll.u32 %s818_s15, 3 }
  0x2f   : > { %640 = vset.pattern.permute.xlu0 %v829_v5  ;;  %641 = vset.pattern.permute.xlu1 %v829_v5  ;;  %v346_v12 = vld [vmem:[%s259_s18] sm:$0xff]  ;;  %s412_s19 = scalar_lea.hbm %s1014_s3, %s562_s24  ;;  %s292_s21 = scalar_lea.vmem [#allocation10], %s955_s1 }
  0x30   : > { %365 = vmatpush.msra.mxu1 %v346_v12  ;;  %s414_s23 = sshll.u32 %s292_s21, 4  ;;  %s416_s6 = sshll.u32 %s412_s19, 4  ;;  %s415_s23 = int_to_ptr.vmem [resolvable:$true] %s414_s23  ;;  %s417_s6 = int_to_ptr.hbm [resolvable:$true] %s416_s6 }
  0x31   : > { %318 = vmatmul.f32.vlgmr.msra.gmra.mxu0 %v300_v1  ;;  %s401_s7 = scalar_lea.sflag [#allocation6], %s952_s22  ;;  %s754_s8 = sshra.s32 %s417_s6, 4  ;;  %s755_s8 = int_to_ptr.hbm [resolvable:$true] %s754_s8 }
  0x32   : > { %s756_s10 = scalar_lea.hbm %s755_s8, 8  ;;  %s760_s9 = scalar_lea.hbm %s1014_s3, 16 }
  0x33   : > { %p757_p4 = scmp.ne.s32.totalorder %s755_s8, %s756_s10  ;;  %p761_p7 = scmp.lt.s32.totalorder %s755_s8, %s1014_s3 }
  0x34   : > { %p762_p8 = scmp.lt.s32.totalorder %s760_s9, %s756_s10 }
  0x35   : > { %v326_v6 = vld [vmem:[#allocation2] sm:$0xff]  ;;  %p758_p5 = pnand %p757_p4, %p906_p9 }
  0x36   : > { %p763_p10 = por %p762_p8, %p761_p7 }
  0x37   : > { %p759_p6 = pneg %p758_p5 }
  0x39   : > { %p764_p13 = pnand %p763_p10, %p759_p6 }
  0xae   : > { %v319_v3 = vpop.f32.mrf.mxu0 }
  0xaf   : > { %v323_v4 = vsel %vm322_vm1, %v319_v3, -inf }
  0xb0   : > { %324 = vmax.xlane.f32.xlu0 %v323_v4 }
 0x123   : > { %v325_v7 = vpop.xlane.xlu0 %324 }
 0x124   : > { %v327_v8 = vmax.f32 %v326_v6, %v325_v7 }
 0x126   : > { %v328_v9 = vsub.f32 %v326_v6, %v327_v8  ;;  %373 = vst.msk [vmem:[#allocation2] sm:$0xff] %vm297_vm0, %v327_v8  ;;  %333 = vperm.xlu0 %640, %v327_v8  }
 0x128   : > { %v329_v10 = vmul.f32 1.442695, %v328_v9 }
 0x12a   : > { %644 = vpow2.f32 %v329_v10 }
 0x12e   : > { %643 = vset.pattern.permute.xlu0 %v830_v17 }
 0x130   : > { %v645_v11 = vpop.eup %644 }
 0x131   : > { %342 = vperm.xlu1 %641, %v645_v11  }
 0x139   : > { %642 = vset.pattern.permute.xlu1 %v830_v17 }
 0x198   : > { %v334_v13 = vpop.permute.xlu0 %333 }
 0x199   : > { %v336_v14 = vsub.f32 %v319_v3, %v334_v13 }
 0x19b   : > { %v337_v15 = vmul.f32 1.442695, %v336_v14 }
 0x19d   : > { %646 = vpow2.f32 %v337_v15 }
 0x1a3   : > { %v647_v16 = vpop.eup %646  ;;  %v343_v18 = vpop.permute.xlu1 %342 }
 0x1a4   : > { %560 = vmatmul.msk.f32.vlgmr.msra.gmra.mxu1 %vm322_vm1, %v647_v16  ;;  %v345_v19 = vmul.f32 0.0, %v343_v18 }
 0x221   : > { %v367_v20 = vpop.f32.mrf.mxu1 }
 0x222   : > { %v370_v21 = vadd.f32 %v367_v20, %v345_v19 }
 0x224   : > { %648 = vrcp.f32 %v370_v21  ;;  %v389_v25 = vand.u32 2147483648, %v370_v21  ;;  %v387_v27 = vand.u32 2147483647, %v370_v21  ;;  %vm383_vm3 = vweird.f32 %v370_v21 }
 0x226   : > { %v390_v29 = vor.u32 1.1754944e-38, %v389_v25  ;;  %vm388_vm5 = vcmp.eq.f32.partialorder %v387_v27, 8.507059e+37 }
 0x22a   : > { %v649_v22 = vpop.eup %648 }
 0x22b   : > { %v379_v23 = vmul.f32 %v649_v22, %v370_v21  ;;  %vm384_vm2 = vweird.f32 %v649_v22 }
 0x22c   : > { %vm385_vm4 = vmor %vm383_vm3, %vm384_vm2 }
 0x22d   : > { %v380_v24 = vsub.f32 1.0, %v379_v23 }
 0x22f   : > { %v381_v26 = vmul.f32 %v649_v22, %v380_v24 }
 0x231   : > { %v382_v28 = vadd.f32 %v649_v22, %v381_v26 }
 0x233   : > { %v386_v30 = vsel %vm385_vm4, %v649_v22, %v382_v28 }
 0x234   : > { %v391_v31 = vsel %vm388_vm5, %v390_v29, %v386_v30 }
 0x235   : > { %395 = vperm.xlu1 %642, %v391_v31  }
 0x2a7   : > { %v396_v32 = vpop.permute.xlu1 %395 }
 0x2a8   : > { %v398_v33 = vmul.f32 %v396_v32, %v370_v21 }
 0x2aa   : > { %399 = vst [vmem:[%s292_s21] sm:$0xff] %v398_v33 }
 0x2ab   : > { %767 = shalt.err (!%p764_p13)
}
 0x2ac   : > { %571 = dma.vmem_to_hbm [thread:$0]  (%p906_p9), %s415_s23, 128, %s417_s6, %s401_s7  }
 0x2ad PF: > { %s428_s22 = sand.u32 1, %s806_s12   ;;  %p584_p0 = pnand %p548_p12, %p913_p11 }
 0x2ae   : > { %s429_s28 = scalar_lea.sflag [#allocation6], %s428_s22 }
 0x2af   : > { %p585_p1 = pneg %p584_p0 }
 0x2b1   : > { %801 = dma.done.wait (%p585_p1), %s429_s28, 128  }
 0x2b2   : > { %803 = vsyncadd (%p585_p1), %s429_s28, 4294967168  ;;  %s22_s17 = sadd.s32 1, %s826_s17   ;;  %s1028_s30 = sld [smem:[#allocation16_spill]] }
 0x2b3   : > { %p19_p2 = scmp.ge.s32.totalorder %s22_s17, 4   ;;  %s1029_s15 = sld [smem:[#allocation14_spill]] }
 0x2b4   : > { %s1030_s16 = sld [smem:[#allocation15_spill]]  ;;  %s1031_s12 = smov %s810_s13 }
 0x2b5   : > { %s1032_s13 = smov %s814_s14  ;;  %21 = sbr.rel (!%p19_p2) target bundleno = 10 (0xa), region = 109 }
 0x2b8   : > { %s1033_s14 = smov %s1028_s30 }
 0x2ba   :  { %435 = vsyncpa [#allocation5], 1 }
 0x2bb   :  { %437 = vsyncpa [#allocation5 + $0x1], 1 }
 0x2bc   :  { %438 = vsyncpa [#allocation8], 1 }
 0x2bd   :  { %440 = vsyncpa [#allocation8 + $0x1], 1 }
 0x2be   :  { %441 = vsyncpa [#allocation6], 1 }
 0x2bf   :  { %443 = vsyncpa [#allocation6 + $0x1], 1 }

</bundles_post_ra>
